<compile_context>
chip_gen: v6e
topology: v6e:2x2x1
jax: 0.10.0
libtpu: 0.0.40
codegen_flags: <defaults>
</compile_context>

<pallas_src>
import jax
import jax.numpy as jnp
from jax.experimental import pallas as pl
from jax.experimental.pallas import tpu as pltpu


def _round_up(v, m):
    return (v + m - 1) // m * m


def _density_mlp_kernel(
    x_ref,                    # (tile_n, input_dim) bf16
    w0_ref, b0_ref,           # (input_dim, H) bf16, (1, H) f32
    ws_ref, bs_ref,           # (3, H, H) bf16, (3, 1, H) f32   -- layers 1..3
    wh_ref, bh_ref,           # (H, out_w) bf16 fused head [wf | wd | 0-pad], (1, out_w) f32
    out_ref,                  # (tile_n, out_w) bf16 lane-dense slab
):
    """4 x (Linear+ReLU) trunk, then one fused lane-dense head matmul."""
    # Layer 0: bf16 operands, f32 accumulate / bias / ReLU.
    h = jnp.maximum(
        jnp.dot(x_ref[...], w0_ref[...], preferred_element_type=jnp.float32)
        + b0_ref[...], 0.0)

    # Layers 1..3 (weights resident as a stacked (3,H,H) block).
    for l in range(3):
        h = jnp.maximum(
            jnp.dot(h.astype(jnp.bfloat16), ws_ref[l],
                    preferred_element_type=jnp.float32)
            + bs_ref[l], 0.0)

    # Fused head: cols [0, H) = feature head (no activation), col H = density
    # logit (ReLU applied in the wrapper slice), rest = zero padding.
    out = (jnp.dot(h.astype(jnp.bfloat16), wh_ref[...],
                   preferred_element_type=jnp.float32)
           + bh_ref[...])
    out_ref[...] = out.astype(out_ref.dtype)


def density_mlp_forward(x, params, *, tile_n=8192):
    """DensityMLP forward pass with a single fused Pallas TPU kernel.

    Args:
      x: [N, input_dim] float32 (any N; padded internally).
      params: dict with w0..w3 (in,out), b0..b3 (1,out), wd (hidden,1),
              bd (1,1), wf (hidden,hidden), bf (1,hidden) — all float32.
    Returns:
      (density [N, 1], feature_vec [N, hidden_dim]) float32.
    """
    f32, bf16 = jnp.float32, jnp.bfloat16
    n, input_dim = x.shape
    hidden_dim = params["w0"].shape[1]

    # ---- weight prep: bf16 matmul operands, f32 biases --------------------
    w0 = params["w0"].astype(bf16)
    b0 = params["b0"].astype(f32)
    w_stack = jnp.stack([params["w1"], params["w2"], params["w3"]]).astype(bf16)
    b_stack = jnp.stack([params["b1"], params["b2"], params["b3"]]).astype(f32)

    # Fused, lane-dense head: [wf | wd | zero pad] -> width % 128 == 0.
    head_w = hidden_dim + 1
    out_w = _round_up(head_w, 128)
    pad_w = out_w - head_w
    wh = jnp.concatenate(
        [params["wf"], params["wd"],
         jnp.zeros((hidden_dim, pad_w), f32)], axis=1).astype(bf16)
    bh = jnp.concatenate(
        [params["bf"], params["bd"], jnp.zeros((1, pad_w), f32)],
        axis=1).astype(f32)

    # ---- row tiling --------------------------------------------------------
    # Big tiles (amortize per-step overhead + MXU fill/drain), but keep >= ~8
    # grid steps for large batches so v7x's two TensorCores both get work.
    n8 = _round_up(max(n, 1), 8)
    target = max(1024, -(-n8 // 8))
    t = min(tile_n, _round_up(target, 8))
    t = max(8, min(t, n8))
    n_pad = _round_up(n, t)
    x_p = jnp.pad(x, ((0, n_pad - n), (0, 0))) if n_pad != n else x
    x_p = x_p.astype(bf16)

    grid = (n_pad // t,)

    def _resident(shape):
        # same block every grid step -> weights DMA'd once, held in VMEM
        nd = len(shape)
        return pl.BlockSpec(shape, lambda i, _nd=nd: (0,) * _nd)

    in_specs = [
        pl.BlockSpec((t, input_dim), lambda i: (i, 0)),     # x tile
        _resident(w0.shape), _resident(b0.shape),
        _resident(w_stack.shape), _resident(b_stack.shape),
        _resident(wh.shape), _resident(bh.shape),
    ]
    out_specs = pl.BlockSpec((t, out_w), lambda i: (i, 0))
    out_shape = jax.ShapeDtypeStruct((n_pad, out_w), bf16)

    # Advisory cost estimate for XLA scheduling.
    flops = 2 * n_pad * (input_dim * hidden_dim
                         + 3 * hidden_dim * hidden_dim
                         + hidden_dim * out_w)
    bytes_accessed = (2 * (x_p.size + n_pad * out_w)                      # bf16 act I/O
                      + 2 * (w0.size + w_stack.size + wh.size)            # bf16 weights
                      + 4 * (b0.size + b_stack.size + bh.size))           # f32 biases

    slab = pl.pallas_call(
        _density_mlp_kernel,
        out_shape=out_shape,
        grid_spec=pl.GridSpec(grid=grid, in_specs=in_specs, out_specs=out_specs),
        compiler_params=pltpu.CompilerParams(
            dimension_semantics=("parallel",),    # shards across TCs on v7x
            vmem_limit_bytes=32 << 20,            # v5e default 16 MiB is too tight
        ),
        cost_estimate=pl.CostEstimate(
            flops=flops, transcendentals=0, bytes_accessed=bytes_accessed),
    )(x_p, w0, b0, w_stack, b_stack, wh, bh)

    # TODO(synk): downstream NeRF code could consume the bf16 slab directly and
    # skip this re-slice / upcast pass entirely.
    feature_vec = slab[:n, :hidden_dim].astype(f32)
    density = jnp.maximum(slab[:n, hidden_dim:hidden_dim + 1], 0).astype(f32)
    return density, feature_vec


def init_params(key, input_dim, hidden_dim):
    """Deterministic PyTorch-style (uniform +-1/sqrt(fan_in)) init."""
    def linear(key, fan_in, fan_out):
        kw, kb = jax.random.split(key)
        bound = 1.0 / jnp.sqrt(fan_in)
        w = jax.random.uniform(kw, (fan_in, fan_out), jnp.float32, -bound, bound)
        b = jax.random.uniform(kb, (1, fan_out), jnp.float32, -bound, bound)
        return w, b

    keys = jax.random.split(key, 6)
    w0, b0 = linear(keys[0], input_dim, hidden_dim)
    w1, b1 = linear(keys[1], hidden_dim, hidden_dim)
    w2, b2 = linear(keys[2], hidden_dim, hidden_dim)
    w3, b3 = linear(keys[3], hidden_dim, hidden_dim)
    wd, bd = linear(keys[4], hidden_dim, 1)
    wf, bf = linear(keys[5], hidden_dim, hidden_dim)
    return dict(w0=w0, b0=b0, w1=w1, b1=b1, w2=w2, b2=b2, w3=w3, b3=b3,
                wd=wd, bd=bd, wf=wf, bf=bf)


def density_mlp_ref(x, p):
    """Pure-JAX f32 reference (mirrors the PyTorch forward)."""
    h = x
    for i in range(4):
        h = jnp.maximum(h @ p[f"w{i}"] + p[f"b{i}"], 0.0)
    density = jnp.maximum(h @ p["wd"] + p["bd"], 0.0)
    feat = h @ p["wf"] + p["bf"]
    return density, feat


if __name__ == "__main__":
    key = jax.random.PRNGKey(0)
    k_x, k_p, k_x2 = jax.random.split(key, 3)

    N, INPUT_DIM, HIDDEN_DIM = 128, 32, 64
    params = init_params(k_p, INPUT_DIM, HIDDEN_DIM)

    # Tolerances are loosened vs. the f32 reference because the kernel uses
    # bf16 MXU operands / bf16 output slab (f32 accumulation).
    ATOL = RTOL = 3e-2

    # case 1: N a multiple of the tile
    x = jax.random.normal(k_x, (N, INPUT_DIM), jnp.float32)
    density, feature_vec = density_mlp_forward(x, params)
    jax.block_until_ready((density, feature_vec))
    d_ref, f_ref = density_mlp_ref(x, params)
    assert density.shape == (N, 1) and feature_vec.shape == (N, HIDDEN_DIM)
    assert jnp.allclose(density, d_ref, atol=ATOL, rtol=RTOL)
    assert jnp.allclose(feature_vec, f_ref, atol=ATOL, rtol=RTOL)

    # case 2: ragged N (exercises the padding path)
    N2 = 200
    x2 = jax.random.normal(k_x2, (N2, INPUT_DIM), jnp.float32)
    d2, f2 = density_mlp_forward(x2, params)
    jax.block_until_ready((d2, f2))
    d2_ref, f2_ref = density_mlp_ref(x2, params)
    assert d2.shape == (N2, 1) and f2.shape == (N2, HIDDEN_DIM)
    assert jnp.allclose(d2, d2_ref, atol=ATOL, rtol=RTOL)
    assert jnp.allclose(f2, f2_ref, atol=ATOL, rtol=RTOL)

    print("KERNEL_OK")
</pallas_src>

<mosaic_0001>
module attributes {stable_mosaic.version = 11 : i64} {
  func.func @_density_mlp_kernel(%arg0: i32, %arg1: memref<128x32xbf16, #tpu.memory_space<vmem>>, %arg2: memref<32x64xbf16, #tpu.memory_space<vmem>>, %arg3: memref<1x64xf32, #tpu.memory_space<vmem>>, %arg4: memref<3x64x64xbf16, #tpu.memory_space<vmem>>, %arg5: memref<3x1x64xf32, #tpu.memory_space<vmem>>, %arg6: memref<64x128xbf16, #tpu.memory_space<vmem>>, %arg7: memref<1x128xf32, #tpu.memory_space<vmem>>, %arg8: memref<128x128xbf16, #tpu.memory_space<vmem>>) attributes {dimension_semantics = [#tpu.dimension_semantics<parallel>], iteration_bounds = array<i64: 1>, scalar_prefetch = 0 : i64, scratch_operands = 0 : i64, tpu.core_type = #tpu.core_type<tc>, window_params = [{transform_indices = @transform_0, window_bounds = array<i64: 128, 32>}, {pipeline_mode = #tpu.pipeline_mode<synchronous>, transform_indices = @transform_1, window_bounds = array<i64: 32, 64>}, {pipeline_mode = #tpu.pipeline_mode<synchronous>, transform_indices = @transform_2, window_bounds = array<i64: 1, 64>}, {pipeline_mode = #tpu.pipeline_mode<synchronous>, transform_indices = @transform_3, window_bounds = array<i64: 3, 64, 64>}, {pipeline_mode = #tpu.pipeline_mode<synchronous>, transform_indices = @transform_4, window_bounds = array<i64: 3, 1, 64>}, {pipeline_mode = #tpu.pipeline_mode<synchronous>, transform_indices = @transform_5, window_bounds = array<i64: 64, 128>}, {pipeline_mode = #tpu.pipeline_mode<synchronous>, transform_indices = @transform_6, window_bounds = array<i64: 1, 128>}, {transform_indices = @transform_7, window_bounds = array<i64: 128, 128>}]} {
    %c0 = arith.constant 0 : index
    %c0_0 = arith.constant 0 : index
    %0 = vector.load %arg1[%c0, %c0_0] : memref<128x32xbf16, #tpu.memory_space<vmem>>, vector<128x32xbf16>
    %c0_1 = arith.constant 0 : index
    %c0_2 = arith.constant 0 : index
    %1 = vector.load %arg2[%c0_1, %c0_2] : memref<32x64xbf16, #tpu.memory_space<vmem>>, vector<32x64xbf16>
    %cst = arith.constant dense<0.000000e+00> : vector<128x64xf32>
    %2 = tpu.matmul %0, %1, %cst {dimension_numbers = #tpu.dot_dimension_numbers<[1], [0], [0], [1], [0, 0, 1, 1], [], []>} : vector<128x32xbf16>, vector<32x64xbf16>, vector<128x64xf32> -> vector<128x64xf32>
    %c0_3 = arith.constant 0 : index
    %c0_4 = arith.constant 0 : index
    %3 = vector.load %arg3[%c0_3, %c0_4] : memref<1x64xf32, #tpu.memory_space<vmem>>, vector<1x64xf32>
    %4 = vector.broadcast %3 : vector<1x64xf32> to vector<128x64xf32>
    %5 = arith.addf %2, %4 : vector<128x64xf32>
    %cst_5 = arith.constant 0.000000e+00 : f32
    %6 = vector.broadcast %cst_5 : f32 to vector<128x64xf32>
    %7 = arith.maximumf %5, %6 : vector<128x64xf32>
    %8 = arith.truncf %7 : vector<128x64xf32> to vector<128x64xbf16>
    %c0_6 = arith.constant 0 : index
    %c0_7 = arith.constant 0 : index
    %c0_8 = arith.constant 0 : index
    %9 = vector.load %arg4[%c0_6, %c0_7, %c0_8] : memref<3x64x64xbf16, #tpu.memory_space<vmem>>, vector<1x64x64xbf16>
    %10 = vector.shape_cast %9 : vector<1x64x64xbf16> to vector<64x64xbf16>
    %cst_9 = arith.constant dense<0.000000e+00> : vector<128x64xf32>
    %11 = tpu.matmul %8, %10, %cst_9 {dimension_numbers = #tpu.dot_dimension_numbers<[1], [0], [0], [1], [0, 0, 1, 1], [], []>} : vector<128x64xbf16>, vector<64x64xbf16>, vector<128x64xf32> -> vector<128x64xf32>
    %c0_10 = arith.constant 0 : index
    %c0_11 = arith.constant 0 : index
    %c0_12 = arith.constant 0 : index
    %12 = vector.load %arg5[%c0_10, %c0_11, %c0_12] : memref<3x1x64xf32, #tpu.memory_space<vmem>>, vector<1x1x64xf32>
    %13 = vector.shape_cast %12 : vector<1x1x64xf32> to vector<1x64xf32>
    %14 = vector.broadcast %13 : vector<1x64xf32> to vector<128x64xf32>
    %15 = arith.addf %11, %14 : vector<128x64xf32>
    %cst_13 = arith.constant 0.000000e+00 : f32
    %16 = vector.broadcast %cst_13 : f32 to vector<128x64xf32>
    %17 = arith.maximumf %15, %16 : vector<128x64xf32>
    %18 = arith.truncf %17 : vector<128x64xf32> to vector<128x64xbf16>
    %c1 = arith.constant 1 : index
    %c0_14 = arith.constant 0 : index
    %c0_15 = arith.constant 0 : index
    %19 = vector.load %arg4[%c1, %c0_14, %c0_15] : memref<3x64x64xbf16, #tpu.memory_space<vmem>>, vector<1x64x64xbf16>
    %20 = vector.shape_cast %19 : vector<1x64x64xbf16> to vector<64x64xbf16>
    %cst_16 = arith.constant dense<0.000000e+00> : vector<128x64xf32>
    %21 = tpu.matmul %18, %20, %cst_16 {dimension_numbers = #tpu.dot_dimension_numbers<[1], [0], [0], [1], [0, 0, 1, 1], [], []>} : vector<128x64xbf16>, vector<64x64xbf16>, vector<128x64xf32> -> vector<128x64xf32>
    %c1_17 = arith.constant 1 : index
    %c0_18 = arith.constant 0 : index
    %c0_19 = arith.constant 0 : index
    %22 = vector.load %arg5[%c1_17, %c0_18, %c0_19] : memref<3x1x64xf32, #tpu.memory_space<vmem>>, vector<1x1x64xf32>
    %23 = vector.shape_cast %22 : vector<1x1x64xf32> to vector<1x64xf32>
    %24 = vector.broadcast %23 : vector<1x64xf32> to vector<128x64xf32>
    %25 = arith.addf %21, %24 : vector<128x64xf32>
    %cst_20 = arith.constant 0.000000e+00 : f32
    %26 = vector.broadcast %cst_20 : f32 to vector<128x64xf32>
    %27 = arith.maximumf %25, %26 : vector<128x64xf32>
    %28 = arith.truncf %27 : vector<128x64xf32> to vector<128x64xbf16>
    %c2 = arith.constant 2 : index
    %c0_21 = arith.constant 0 : index
    %c0_22 = arith.constant 0 : index
    %29 = vector.load %arg4[%c2, %c0_21, %c0_22] : memref<3x64x64xbf16, #tpu.memory_space<vmem>>, vector<1x64x64xbf16>
    %30 = vector.shape_cast %29 : vector<1x64x64xbf16> to vector<64x64xbf16>
    %cst_23 = arith.constant dense<0.000000e+00> : vector<128x64xf32>
    %31 = tpu.matmul %28, %30, %cst_23 {dimension_numbers = #tpu.dot_dimension_numbers<[1], [0], [0], [1], [0, 0, 1, 1], [], []>} : vector<128x64xbf16>, vector<64x64xbf16>, vector<128x64xf32> -> vector<128x64xf32>
    %c2_24 = arith.constant 2 : index
    %c0_25 = arith.constant 0 : index
    %c0_26 = arith.constant 0 : index
    %32 = vector.load %arg5[%c2_24, %c0_25, %c0_26] : memref<3x1x64xf32, #tpu.memory_space<vmem>>, vector<1x1x64xf32>
    %33 = vector.shape_cast %32 : vector<1x1x64xf32> to vector<1x64xf32>
    %34 = vector.broadcast %33 : vector<1x64xf32> to vector<128x64xf32>
    %35 = arith.addf %31, %34 : vector<128x64xf32>
    %cst_27 = arith.constant 0.000000e+00 : f32
    %36 = vector.broadcast %cst_27 : f32 to vector<128x64xf32>
    %37 = arith.maximumf %35, %36 : vector<128x64xf32>
    %38 = arith.truncf %37 : vector<128x64xf32> to vector<128x64xbf16>
    %c0_28 = arith.constant 0 : index
    %c0_29 = arith.constant 0 : index
    %39 = vector.load %arg6[%c0_28, %c0_29] : memref<64x128xbf16, #tpu.memory_space<vmem>>, vector<64x128xbf16>
    %cst_30 = arith.constant dense<0.000000e+00> : vector<128x128xf32>
    %40 = tpu.matmul %38, %39, %cst_30 {dimension_numbers = #tpu.dot_dimension_numbers<[1], [0], [0], [1], [0, 0, 1, 1], [], []>} : vector<128x64xbf16>, vector<64x128xbf16>, vector<128x128xf32> -> vector<128x128xf32>
    %c0_31 = arith.constant 0 : index
    %c0_32 = arith.constant 0 : index
    %41 = vector.load %arg7[%c0_31, %c0_32] : memref<1x128xf32, #tpu.memory_space<vmem>>, vector<1x128xf32>
    %42 = vector.broadcast %41 : vector<1x128xf32> to vector<128x128xf32>
    %43 = arith.addf %40, %42 : vector<128x128xf32>
    %44 = arith.truncf %43 : vector<128x128xf32> to vector<128x128xbf16>
    %c0_33 = arith.constant 0 : index
    %c0_34 = arith.constant 0 : index
    %45 = vector.load %arg8[%c0_33, %c0_34] : memref<128x128xbf16, #tpu.memory_space<vmem>>, vector<128x128xbf16>
    tpu.vector_store %arg8[%c0_33, %c0_34], %44 {strides = array<i32>} : memref<128x128xbf16, #tpu.memory_space<vmem>>, vector<128x128xbf16>,
    return
  }
  func.func @transform_0(%arg0: i32) -> (i32, i32) {
    %c0_i32 = arith.constant 0 : i32
    %c0_i32_0 = arith.constant 0 : i32
    return %arg0, %c0_i32 : i32, i32
  }
  func.func @transform_1(%arg0: i32) -> (i32, i32) {
    %c0_i32 = arith.constant 0 : i32
    %c0_i32_0 = arith.constant 0 : i32
    %c0_i32_1 = arith.constant 0 : i32
    return %c0_i32, %c0_i32_0 : i32, i32
  }
  func.func @transform_2(%arg0: i32) -> (i32, i32) {
    %c0_i32 = arith.constant 0 : i32
    %c0_i32_0 = arith.constant 0 : i32
    %c0_i32_1 = arith.constant 0 : i32
    return %c0_i32, %c0_i32_0 : i32, i32
  }
  func.func @transform_3(%arg0: i32) -> (i32, i32, i32) {
    %c0_i32 = arith.constant 0 : i32
    %c0_i32_0 = arith.constant 0 : i32
    %c0_i32_1 = arith.constant 0 : i32
    %c0_i32_2 = arith.constant 0 : i32
    return %c0_i32, %c0_i32_0, %c0_i32_1 : i32, i32, i32
  }
  func.func @transform_4(%arg0: i32) -> (i32, i32, i32) {
    %c0_i32 = arith.constant 0 : i32
    %c0_i32_0 = arith.constant 0 : i32
    %c0_i32_1 = arith.constant 0 : i32
    %c0_i32_2 = arith.constant 0 : i32
    return %c0_i32, %c0_i32_0, %c0_i32_1 : i32, i32, i32
  }
  func.func @transform_5(%arg0: i32) -> (i32, i32) {
    %c0_i32 = arith.constant 0 : i32
    %c0_i32_0 = arith.constant 0 : i32
    %c0_i32_1 = arith.constant 0 : i32
    return %c0_i32, %c0_i32_0 : i32, i32
  }
  func.func @transform_6(%arg0: i32) -> (i32, i32) {
    %c0_i32 = arith.constant 0 : i32
    %c0_i32_0 = arith.constant 0 : i32
    %c0_i32_1 = arith.constant 0 : i32
    return %c0_i32, %c0_i32_0 : i32, i32
  }
  func.func @transform_7(%arg0: i32) -> (i32, i32) {
    %c0_i32 = arith.constant 0 : i32
    %c0_i32_0 = arith.constant 0 : i32
    return %arg0, %c0_i32 : i32, i32
  }
}

</mosaic_0001>

<bundles_post_ra>
// kernel: tpu_custom_call.1
= control target key start
LH: loop header
LB: loop body
LE: loop exit
PB: predicated region body
PF: predicated region fallthrough
CT: control target
= control target key end

     0   :  { %12 = vsyncpa [#allocation3], 0  ;;  %s1638_s0 = inlined_call_operand.vmem [shape: bf16[128,32], index: 0, kind: input, shape index: {}]   ;;  %s1639_s1 = inlined_call_operand.vmem [shape: bf16[32,64], index: 1, kind: input, shape index: {}]   ;;  %s1640_s2 = inlined_call_operand.vmem [shape: f32[1,64], index: 2, kind: input, shape index: {}]   ;;  %s1641_s3 = inlined_call_operand.hbm [shape: bf16[3,64,64], index: 3, kind: input, shape index: {}]   ;;  %s1642_s4 = inlined_call_operand.vmem [shape: f32[3,1,64], index: 4, kind: input, shape index: {}]   ;;  %s1643_s5 = inlined_call_operand.vmem [shape: bf16[64,128], index: 5, kind: input, shape index: {}]   ;;  %s1644_s6 = inlined_call_operand.vmem [shape: f32[1,128], index: 6, kind: input, shape index: {}]   ;;  %s1645_s7 = inlined_call_operand.hbm [shape: bf16[128,128], index: 7, kind: output, shape index: {}]  }
   0x1   :  { %13 = vsyncpa [#allocation4], 0  ;;  %s1485_s24 = smov [#allocation2]  }
   0x2   :  { %s25_s25 = sshll.u32 %s1485_s24, 4  ;;  %s26_s25 = int_to_ptr.vmem [resolvable:$true] %s25_s25 }
   0x3   :  { %s1449_s26 = scalar_lea.vmem %s26_s25, 1536  ;;  %p1454_p1 = scmp.lt.s32.totalorder %s26_s25, %s26_s25 }
   0x4   :  { %p1450_p0 = scmp.ne.s32.totalorder %s26_s25, %s1449_s26  ;;  %p1455_p2 = scmp.lt.s32.totalorder %s1449_s26, %s1449_s26 }
   0x6   :  { %p1456_p3 = por %p1455_p2, %p1454_p1 }
   0x8   :  { %p1457_p4 = pnand %p1456_p3, %p1450_p0 }
   0xa   :  { %1460 = shalt.err (!%p1457_p4)
}
   0xb   :  { %s1486_s27 = smov 64   ;;  %s1487_s28 = smov 4  }
   0xc   :  { %31 = dma.hbm_to_vmem [thread:$0]  %s1641_s3, 1536, %s26_s25, [#allocation3], %s1486_s27, %s1486_s27, %s1487_s28  }
   0xd   :  { %1481 = dma.done.wait [#allocation3], 1536  }
   0xe   :  { %1482 = vsyncadd [#allocation3], 4294965760  ;;  %v1415_v0 = vld [vmem:[%s1639_s1 + $0x8] sm:$0xff]   ;;  %v1416_v1 = vld [vmem:[%s1639_s1] sm:$0xff]   ;;  %vm121_vm0 = vcmask 261120   ;;  %vm306_vm1 = vcmask 523264  }
   0xf   :  { %1291 = vmatprep.subr.bf16.mxu0 %v1415_v0  ;;  %v1417_v2 = vld [vmem:[%s1638_s0] sm:$0xff]   ;;  %1407 = vmatprep.subr.bf16.mxu1 %v1415_v0  ;;  %v1418_v3 = vld [vmem:[%s1638_s0 + $0x8] sm:$0xff]   ;;  %v1419_v4 = vld [vmem:[%s1638_s0 + $0x10] sm:$0xff]  }
  0x10   :  { %1292 = vmatpush3.bf16.msra.mxu0 %v1415_v0  ;;  %1409 = vmatpush3.bf16.msra.mxu1 %v1415_v0  ;;  %v1421_v5 = vld [vmem:[%s1638_s0 + $0x20] sm:$0xff]   ;;  %v1422_v6 = vld [vmem:[%s1638_s0 + $0x28] sm:$0xff]   ;;  %v1423_v7 = vld [vmem:[%s1638_s0 + $0x30] sm:$0xff]  }
  0x11   :  { %1293 = vmatprep.subr.bf16.mxu0 %v1416_v1  ;;  %1295 = vmatprep.mubr.msk.bf16.mxu0 %vm121_vm0, %v1417_v2  ;;  %v1425_v8 = vld [vmem:[#allocation2 + $0x18] sm:$0xff]   ;;  %v1426_v11 = vld [vmem:[#allocation2 + $0x10] sm:$0xff]   ;;  %v1427_v12 = vld [vmem:[#allocation2 + $0x8] sm:$0xff]  }
  0x12   :  { %1408 = vmatprep.subr.bf16.mxu1 %v1416_v1  ;;  %1303 = vmatprep.mubr.msk.bf16.mxu1 %vm121_vm0, %v1421_v5  ;;  %v1420_v9 = vld [vmem:[%s1638_s0 + $0x18] sm:$0xff]   ;;  %v1428_v13 = vld [vmem:[#allocation2] sm:$0xff]  }
  0x13   :  { %v1424_v10 = vld [vmem:[%s1638_s0 + $0x38] sm:$0xff]   ;;  %v1081_v19 = vld [vmem:[%s1640_s2] ss:$0 sm:$0xff] }
  0x14   :  { %1294 = vmatpush3.bf16.msra.mxu0 %v1416_v1  ;;  %1410 = vmatpush3.bf16.msra.mxu1 %v1416_v1  ;;  %v1429_v14 = vld [vmem:[#allocation2 + $0x38] sm:$0xff]  }
  0x15   :  { %1311 = vmatprep.subr.bf16.mxu1 %v1425_v8  ;;  %1335 = vmatprep.subr.bf16.mxu0 %v1429_v14 }
  0x17   :  { %1296 = vmatmul.mubr.msk.bf16.vlgmr.msra.gmra.mxu0 %vm121_vm0, %v1418_v3  ;;  %1304 = vmatmul.mubr.msk.bf16.vlgmr.msra.gmra.mxu1 %vm121_vm0, %v1422_v6 }
  0x18   :  { %1299 = vmatprep.mubr.msk.bf16.mxu0 %vm121_vm0, %v1419_v4  ;;  %1307 = vmatprep.mubr.msk.bf16.mxu1 %vm121_vm0, %v1423_v7 }
  0x19   :  { %1312 = vmatpush3.bf16.msra.mxu1 %v1425_v8  ;;  %1336 = vmatpush3.bf16.msra.mxu0 %v1429_v14  ;;  %v1430_v8 = vld [vmem:[#allocation2 + $0x30] sm:$0xff]  }
  0x1a   :  { %1313 = vmatprep.subr.bf16.mxu1 %v1426_v11  ;;  %1337 = vmatprep.subr.bf16.mxu0 %v1430_v8 }
  0x1d   :  { %1314 = vmatpush3.bf16.msra.mxu1 %v1426_v11  ;;  %1338 = vmatpush3.bf16.msra.mxu0 %v1430_v8  ;;  %v1433_v11 = vld [vmem:[#allocation2 + $0x58] sm:$0xff]  }
  0x1e   :  { %1315 = vmatprep.subr.bf16.mxu1 %v1427_v12  ;;  %v1437_v8 = vld [vmem:[%s1643_s5 + $0x18] sm:$0xff]  }
  0x1f   :  { %1300 = vmatmul.mubr.msk.bf16.gmra.mxu0 %vm121_vm0, %v1420_v9  ;;  %1308 = vmatmul.mubr.msk.bf16.gmra.mxu1 %vm121_vm0, %v1424_v10  ;;  %v1431_v9 = vld [vmem:[#allocation2 + $0x28] sm:$0xff]   ;;  %v1432_v10 = vld [vmem:[#allocation2 + $0x20] sm:$0xff]  }
  0x20   :  { %1339 = vmatprep.subr.bf16.mxu0 %v1431_v9 }
  0x21   :  { %1316 = vmatpush3.bf16.msra.mxu1 %v1427_v12  ;;  %1340 = vmatpush3.bf16.msra.mxu0 %v1431_v9  ;;  %v1434_v12 = vld [vmem:[#allocation2 + $0x50] sm:$0xff]  }
  0x22   :  { %1317 = vmatprep.subr.bf16.mxu1 %v1428_v13  ;;  %1341 = vmatprep.subr.bf16.mxu0 %v1432_v10  ;;  %v1438_v9 = vld [vmem:[%s1643_s5 + $0x10] sm:$0xff]  }
  0x25   :  { %1318 = vmatpush3.bf16.msra.mxu1 %v1428_v13  ;;  %1342 = vmatpush3.bf16.msra.mxu0 %v1432_v10  ;;  %v1435_v13 = vld [vmem:[#allocation2 + $0x48] sm:$0xff]  }
  0x26   :  { %1359 = vmatprep.subr.bf16.mxu1 %v1433_v11  ;;  %1383 = vmatprep.subr.bf16.mxu0 %v1437_v8  ;;  %v1439_v10 = vld [vmem:[%s1643_s5 + $0x8] sm:$0xff]  }
  0xd7   :  { %v1297_v15 = vpop.f32.mrf.mxu0  ;;  %v1305_v16 = vpop.f32.mrf.mxu1 }
  0xd8   :  { %v189_v24 = vadd.f32 %v1297_v15, %v1081_v19  ;;  %v221_v58 = vadd.f32 %v1305_v16, %v1081_v19  ;;  %v1100_v16 = vld [vmem:[%s1642_s4] ss:$0 sm:$0xff] }
  0xd9   :  { %v180_v17 = vpop.f32.mrf.mxu0  ;;  %v212_v18 = vpop.f32.mrf.mxu1 }
  0xda   :  { %v181_v22 = vadd.f32 %v1081_v19, %v180_v17  ;;  %v245_v33 = vmax.f32 %v189_v24, 0.0  ;;  %v213_v37 = vadd.f32 %v1081_v19, %v212_v18  ;;  %v253_v63 = vmax.f32 %v221_v58, 0.0 }
  0xdb   :  { %v1298_v20 = vpop.f32.mrf.mxu0  ;;  %v1306_v21 = vpop.f32.mrf.mxu1 }
  0xdc   :  { %v192_v23 = vadd.f32 %v1298_v20, %v1081_v19  ;;  %v243_v31 = vmax.f32 %v181_v22, 0.0  ;;  %v251_v46 = vmax.f32 %v213_v37, 0.0  ;;  %v224_v60 = vadd.f32 %v1306_v21, %v1081_v19 }
  0xdd   :  { %v183_v25 = vpop.f32.mrf.mxu0  ;;  %v215_v26 = vpop.f32.mrf.mxu1 }
  0xde   :  { %v184_v27 = vadd.f32 %v1081_v19, %v183_v25  ;;  %v246_v28 = vmax.f32 %v192_v23, 0.0  ;;  %v216_v38 = vadd.f32 %v1081_v19, %v215_v26  ;;  %v254_v0 = vmax.f32 %v224_v60, 0.0 }
  0xdf   :  { %v1301_v29 = vpop.f32.mrf.mxu0  ;;  %v1309_v30 = vpop.f32.mrf.mxu1 }
  0xe0   :  { %v244_v32 = vmax.f32 %v184_v27, 0.0  ;;  %v260_v39 = vpack.c.bf16 %v246_v28, %v245_v33  ;;  %v205_v44 = vadd.f32 %v1301_v29, %v1081_v19  ;;  %v252_v48 = vmax.f32 %v216_v38, 0.0 }
  0xe1   :  { %v196_v34 = vpop.f32.mrf.mxu0  ;;  %v228_v35 = vpop.f32.mrf.mxu1  ;;  %v264_v2 = vpack.c.bf16 %v254_v0, %v253_v63  ;;  %v237_v3 = vadd.f32 %v1309_v30, %v1081_v19 }
  0xe2   :  { %v259_v36 = vpack.c.bf16 %v244_v32, %v243_v31  ;;  %v197_v42 = vadd.f32 %v1081_v19, %v196_v34  ;;  %v249_v53 = vmax.f32 %v205_v44, 0.0  ;;  %v263_v55 = vpack.c.bf16 %v252_v48, %v251_v46 }
  0xe3   :  { %v1302_v40 = vpop.f32.mrf.mxu0  ;;  %v1310_v41 = vpop.f32.mrf.mxu1  ;;  %v229_v56 = vadd.f32 %v1081_v19, %v228_v35  ;;  %v257_v5 = vmax.f32 %v237_v3, 0.0 }
  0xe4   :  { %v208_v43 = vadd.f32 %v1302_v40, %v1081_v19  ;;  %1319 = vmatprep.mubr.msk.bf16.mxu1 %vm306_vm1, %v259_v36  ;;  %v247_v51 = vmax.f32 %v197_v42, 0.0  ;;  %v240_v4 = vadd.f32 %v1310_v41, %v1081_v19 }
  0xe5   :  { %v199_v45 = vpop.f32.mrf.mxu0  ;;  %1320 = vmatmul.mubr.msk.bf16.vlgmr.msra.gmra.mxu1 %vm306_vm1, %v260_v39  ;;  %v231_v50 = vpop.f32.mrf.mxu1  ;;  %v255_v61 = vmax.f32 %v229_v56, 0.0 }
  0xe6   :  { %v200_v47 = vadd.f32 %v1081_v19, %v199_v45  ;;  %v250_v49 = vmax.f32 %v208_v43, 0.0  ;;  %v232_v57 = vadd.f32 %v1081_v19, %v231_v50  ;;  %v258_v6 = vmax.f32 %v240_v4, 0.0  ;;  %1360 = vmatpush3.bf16.msra.mxu1 %v1433_v11 }
  0xe7   :  { %1361 = vmatprep.subr.bf16.mxu1 %v1434_v12 }
  0xe8   :  { %v248_v52 = vmax.f32 %v200_v47, 0.0  ;;  %v262_v59 = vpack.c.bf16 %v250_v49, %v249_v53  ;;  %v256_v62 = vmax.f32 %v232_v57, 0.0  ;;  %v266_v7 = vpack.c.bf16 %v258_v6, %v257_v5 }
  0xea   :  { %v261_v54 = vpack.c.bf16 %v248_v52, %v247_v51  ;;  %v265_v1 = vpack.c.bf16 %v256_v62, %v255_v61  ;;  %1362 = vmatpush3.bf16.msra.mxu1 %v1434_v12 }
  0xeb   :  { %1363 = vmatprep.subr.bf16.mxu1 %v1435_v13 }
  0xec   :  { %1323 = vmatprep.mubr.msk.bf16.mxu1 %vm306_vm1, %v261_v54 }
  0xed   :  { %1324 = vmatmul.mubr.msk.bf16.gmra.mxu1 %vm306_vm1, %v262_v59 }
  0xee   :  { %1327 = vmatprep.mubr.msk.bf16.mxu1 %vm306_vm1, %v263_v55  ;;  %1364 = vmatpush3.bf16.msra.mxu1 %v1435_v13  ;;  %v1114_v13 = vld [vmem:[%s1642_s4 + $0x1] ss:$0 sm:$0xff] }
  0xf5   :  { %1328 = vmatmul.mubr.msk.bf16.gmra.mxu1 %vm306_vm1, %v264_v2 }
  0xf6   :  { %1331 = vmatprep.mubr.msk.bf16.mxu1 %vm306_vm1, %v265_v1 }
  0xfd   :  { %1332 = vmatmul.mubr.msk.bf16.gmra.mxu1 %vm306_vm1, %v266_v7  ;;  %v1436_v7 = vld [vmem:[#allocation2 + $0x40] sm:$0xff]  }
  0xfe   :  { %1365 = vmatprep.subr.bf16.mxu1 %v1436_v7 }
  0xff   :  { %1366 = vmatpush3.bf16.msra.mxu1 %v1436_v7  ;;  %v1128_v7 = vld [vmem:[%s1642_s4 + $0x2] ss:$0 sm:$0xff] }
 0x1a5   :  { %v1321_v14 = vpop.f32.mrf.mxu1 }
 0x1a6   :  { %v374_v20 = vadd.f32 %v1321_v14, %v1100_v16 }
 0x1a7   :  { %v365_v15 = vpop.f32.mrf.mxu1 }
 0x1a8   :  { %v366_v18 = vadd.f32 %v1100_v16, %v365_v15  ;;  %v430_v27 = vmax.f32 %v374_v20, 0.0 }
 0x1a9   :  { %v1322_v17 = vpop.f32.mrf.mxu1 }
 0x1aa   :  { %v377_v19 = vadd.f32 %v1322_v17, %v1100_v16  ;;  %v428_v25 = vmax.f32 %v366_v18, 0.0 }
 0x1ab   :  { %v368_v21 = vpop.f32.mrf.mxu1 }
 0x1ac   :  { %v369_v22 = vadd.f32 %v1100_v16, %v368_v21  ;;  %v431_v23 = vmax.f32 %v377_v19, 0.0 }
 0x1ad   :  { %v1325_v24 = vpop.f32.mrf.mxu1 }
 0x1ae   :  { %v429_v26 = vmax.f32 %v369_v22, 0.0  ;;  %v445_v30 = vpack.c.bf16 %v431_v23, %v430_v27  ;;  %v390_v34 = vadd.f32 %v1325_v24, %v1100_v16 }
 0x1af   :  { %v381_v28 = vpop.f32.mrf.mxu1 }
 0x1b0   :  { %v444_v29 = vpack.c.bf16 %v429_v26, %v428_v25  ;;  %v382_v32 = vadd.f32 %v1100_v16, %v381_v28  ;;  %v434_v41 = vmax.f32 %v390_v34, 0.0 }
 0x1b1   :  { %v1326_v31 = vpop.f32.mrf.mxu1 }
 0x1b2   :  { %v393_v33 = vadd.f32 %v1326_v31, %v1100_v16  ;;  %1343 = vmatprep.mubr.msk.bf16.mxu0 %vm306_vm1, %v444_v29  ;;  %v432_v39 = vmax.f32 %v382_v32, 0.0 }
 0x1b3   :  { %v384_v35 = vpop.f32.mrf.mxu1  ;;  %1344 = vmatmul.mubr.msk.bf16.vlgmr.msra.gmra.mxu0 %vm306_vm1, %v445_v30 }
 0x1b4   :  { %v385_v36 = vadd.f32 %v1100_v16, %v384_v35  ;;  %v435_v37 = vmax.f32 %v393_v33, 0.0  ;;  %1384 = vmatpush3.bf16.msra.mxu0 %v1437_v8 }
 0x1b5   :  { %v1329_v38 = vpop.f32.mrf.mxu1  ;;  %1385 = vmatprep.subr.bf16.mxu0 %v1438_v9 }
 0x1b6   :  { %v433_v40 = vmax.f32 %v385_v36, 0.0  ;;  %v447_v44 = vpack.c.bf16 %v435_v37, %v434_v41  ;;  %v406_v48 = vadd.f32 %v1329_v38, %v1100_v16 }
 0x1b7   :  { %v397_v42 = vpop.f32.mrf.mxu1 }
 0x1b8   :  { %v446_v43 = vpack.c.bf16 %v433_v40, %v432_v39  ;;  %v398_v46 = vadd.f32 %v1100_v16, %v397_v42  ;;  %v438_v55 = vmax.f32 %v406_v48, 0.0  ;;  %1386 = vmatpush3.bf16.msra.mxu0 %v1438_v9 }
 0x1b9   :  { %v1330_v45 = vpop.f32.mrf.mxu1  ;;  %1387 = vmatprep.subr.bf16.mxu0 %v1439_v10 }
 0x1ba   :  { %v409_v47 = vadd.f32 %v1330_v45, %v1100_v16  ;;  %1347 = vmatprep.mubr.msk.bf16.mxu0 %vm306_vm1, %v446_v43  ;;  %v436_v53 = vmax.f32 %v398_v46, 0.0 }
 0x1bb   :  { %v400_v49 = vpop.f32.mrf.mxu1  ;;  %1348 = vmatmul.mubr.msk.bf16.gmra.mxu0 %vm306_vm1, %v447_v44 }
 0x1bc   :  { %v401_v50 = vadd.f32 %v1100_v16, %v400_v49  ;;  %v439_v51 = vmax.f32 %v409_v47, 0.0  ;;  %1388 = vmatpush3.bf16.msra.mxu0 %v1439_v10 }
 0x1bd   :  { %v1333_v52 = vpop.f32.mrf.mxu1 }
 0x1be   :  { %v437_v54 = vmax.f32 %v401_v50, 0.0  ;;  %v449_v58 = vpack.c.bf16 %v439_v51, %v438_v55  ;;  %v422_v62 = vadd.f32 %v1333_v52, %v1100_v16 }
 0x1bf   :  { %v413_v56 = vpop.f32.mrf.mxu1 }
 0x1c0   :  { %v448_v57 = vpack.c.bf16 %v437_v54, %v436_v53  ;;  %v414_v60 = vadd.f32 %v1100_v16, %v413_v56  ;;  %v442_v4 = vmax.f32 %v422_v62, 0.0 }
 0x1c1   :  { %v1334_v59 = vpop.f32.mrf.mxu1 }
 0x1c2   :  { %v425_v61 = vadd.f32 %v1334_v59, %v1100_v16  ;;  %1351 = vmatprep.mubr.msk.bf16.mxu0 %vm306_vm1, %v448_v57  ;;  %v440_v2 = vmax.f32 %v414_v60, 0.0 }
 0x1c3   :  { %v416_v63 = vpop.f32.mrf.mxu1  ;;  %1352 = vmatmul.mubr.msk.bf16.gmra.mxu0 %vm306_vm1, %v449_v58 }
 0x1c4   :  { %v417_v0 = vadd.f32 %v1100_v16, %v416_v63  ;;  %v443_v1 = vmax.f32 %v425_v61, 0.0 }
 0x1c6   :  { %v441_v3 = vmax.f32 %v417_v0, 0.0  ;;  %v451_v6 = vpack.c.bf16 %v443_v1, %v442_v4  ;;  %v1440_v4 = vld [vmem:[%s1643_s5] sm:$0xff]  }
 0x1c7   :  { %1389 = vmatprep.subr.bf16.mxu0 %v1440_v4 }
 0x1c8   :  { %v450_v5 = vpack.c.bf16 %v441_v3, %v440_v2  ;;  %1390 = vmatpush3.bf16.msra.mxu0 %v1440_v4 }
 0x1ca   :  { %1355 = vmatprep.mubr.msk.bf16.mxu0 %vm306_vm1, %v450_v5 }
 0x1cb   :  { %1356 = vmatmul.mubr.msk.bf16.gmra.mxu0 %vm306_vm1, %v451_v6 }
 0x273   :  { %v1345_v11 = vpop.f32.mrf.mxu0 }
 0x274   :  { %v560_v17 = vadd.f32 %v1345_v11, %v1114_v13 }
 0x275   :  { %v551_v12 = vpop.f32.mrf.mxu0 }
 0x276   :  { %v552_v15 = vadd.f32 %v1114_v13, %v551_v12  ;;  %v616_v24 = vmax.f32 %v560_v17, 0.0 }
 0x277   :  { %v1346_v14 = vpop.f32.mrf.mxu0 }
 0x278   :  { %v563_v16 = vadd.f32 %v1346_v14, %v1114_v13  ;;  %v614_v22 = vmax.f32 %v552_v15, 0.0 }
 0x279   :  { %v554_v18 = vpop.f32.mrf.mxu0 }
 0x27a   :  { %v555_v19 = vadd.f32 %v1114_v13, %v554_v18  ;;  %v617_v20 = vmax.f32 %v563_v16, 0.0 }
 0x27b   :  { %v1349_v21 = vpop.f32.mrf.mxu0 }
 0x27c   :  { %v615_v23 = vmax.f32 %v555_v19, 0.0  ;;  %v631_v27 = vpack.c.bf16 %v617_v20, %v616_v24  ;;  %v576_v31 = vadd.f32 %v1349_v21, %v1114_v13 }
 0x27d   :  { %v567_v25 = vpop.f32.mrf.mxu0 }
 0x27e   :  { %v630_v26 = vpack.c.bf16 %v615_v23, %v614_v22  ;;  %v568_v29 = vadd.f32 %v1114_v13, %v567_v25  ;;  %v620_v38 = vmax.f32 %v576_v31, 0.0 }
 0x27f   :  { %v1350_v28 = vpop.f32.mrf.mxu0 }
 0x280   :  { %v579_v30 = vadd.f32 %v1350_v28, %v1114_v13  ;;  %1367 = vmatprep.mubr.msk.bf16.mxu1 %vm306_vm1, %v630_v26  ;;  %v618_v36 = vmax.f32 %v568_v29, 0.0 }
 0x281   :  { %v570_v32 = vpop.f32.mrf.mxu0  ;;  %1368 = vmatmul.mubr.msk.bf16.vlgmr.msra.gmra.mxu1 %vm306_vm1, %v631_v27 }
 0x282   :  { %v571_v33 = vadd.f32 %v1114_v13, %v570_v32  ;;  %v621_v34 = vmax.f32 %v579_v30, 0.0 }
 0x283   :  { %v1353_v35 = vpop.f32.mrf.mxu0 }
 0x284   :  { %v619_v37 = vmax.f32 %v571_v33, 0.0  ;;  %v633_v41 = vpack.c.bf16 %v621_v34, %v620_v38  ;;  %v592_v45 = vadd.f32 %v1353_v35, %v1114_v13 }
 0x285   :  { %v583_v39 = vpop.f32.mrf.mxu0 }
 0x286   :  { %v632_v40 = vpack.c.bf16 %v619_v37, %v618_v36  ;;  %v584_v43 = vadd.f32 %v1114_v13, %v583_v39  ;;  %v624_v52 = vmax.f32 %v592_v45, 0.0 }
 0x287   :  { %v1354_v42 = vpop.f32.mrf.mxu0 }
 0x288   :  { %v595_v44 = vadd.f32 %v1354_v42, %v1114_v13  ;;  %1371 = vmatprep.mubr.msk.bf16.mxu1 %vm306_vm1, %v632_v40  ;;  %v622_v50 = vmax.f32 %v584_v43, 0.0 }
 0x289   :  { %v586_v46 = vpop.f32.mrf.mxu0  ;;  %1372 = vmatmul.mubr.msk.bf16.gmra.mxu1 %vm306_vm1, %v633_v41 }
 0x28a   :  { %v587_v47 = vadd.f32 %v1114_v13, %v586_v46  ;;  %v625_v48 = vmax.f32 %v595_v44, 0.0 }
 0x28b   :  { %v1357_v49 = vpop.f32.mrf.mxu0 }
 0x28c   :  { %v623_v51 = vmax.f32 %v587_v47, 0.0  ;;  %v635_v55 = vpack.c.bf16 %v625_v48, %v624_v52  ;;  %v608_v59 = vadd.f32 %v1357_v49, %v1114_v13 }
 0x28d   :  { %v599_v53 = vpop.f32.mrf.mxu0 }
 0x28e   :  { %v634_v54 = vpack.c.bf16 %v623_v51, %v622_v50  ;;  %v600_v57 = vadd.f32 %v1114_v13, %v599_v53  ;;  %v628_v1 = vmax.f32 %v608_v59, 0.0 }
 0x28f   :  { %v1358_v56 = vpop.f32.mrf.mxu0 }
 0x290   :  { %v611_v58 = vadd.f32 %v1358_v56, %v1114_v13  ;;  %1375 = vmatprep.mubr.msk.bf16.mxu1 %vm306_vm1, %v634_v54  ;;  %v626_v63 = vmax.f32 %v600_v57, 0.0 }
 0x291   :  { %v602_v60 = vpop.f32.mrf.mxu0  ;;  %1376 = vmatmul.mubr.msk.bf16.gmra.mxu1 %vm306_vm1, %v635_v55 }
 0x292   :  { %v603_v61 = vadd.f32 %v1114_v13, %v602_v60  ;;  %v629_v62 = vmax.f32 %v611_v58, 0.0 }
 0x294   :  { %v627_v0 = vmax.f32 %v603_v61, 0.0  ;;  %v637_v3 = vpack.c.bf16 %v629_v62, %v628_v1 }
 0x296   :  { %v636_v2 = vpack.c.bf16 %v627_v0, %v626_v63  ;;  %v1141_v63 = vld [vmem:[%s1644_s6] ss:$0 sm:$0xff]  ;;  %s1488_s6 = smov [#allocation5]  }
 0x297   :  { %s1069_s17 = sshll.u32 %s1488_s6, 4  ;;  %s1070_s17 = int_to_ptr.vmem [resolvable:$true] %s1069_s17 }
 0x298   :  { %1379 = vmatprep.mubr.msk.bf16.mxu1 %vm306_vm1, %v636_v2  ;;  %s1461_s18 = scalar_lea.vmem %s1070_s17, 1024  ;;  %p1466_p6 = scmp.lt.s32.totalorder %s1070_s17, %s1070_s17 }
 0x299   :  { %1380 = vmatmul.mubr.msk.bf16.gmra.mxu1 %vm306_vm1, %v637_v3  ;;  %p1462_p5 = scmp.ne.s32.totalorder %s1070_s17, %s1461_s18  ;;  %p1467_p7 = scmp.lt.s32.totalorder %s1461_s18, %s1461_s18 }
 0x29b   :  { %p1468_p8 = por %p1467_p7, %p1466_p6 }
 0x29d   :  { %p1469_p9 = pnand %p1468_p8, %p1462_p5 }
 0x341   :  { %v1369_v5 = vpop.f32.mrf.mxu1 }
 0x342   :  { %v746_v11 = vadd.f32 %v1369_v5, %v1128_v7 }
 0x343   :  { %v737_v6 = vpop.f32.mrf.mxu1 }
 0x344   :  { %v738_v9 = vadd.f32 %v1128_v7, %v737_v6  ;;  %v802_v18 = vmax.f32 %v746_v11, 0.0 }
 0x345   :  { %v1370_v8 = vpop.f32.mrf.mxu1 }
 0x346   :  { %v749_v10 = vadd.f32 %v1370_v8, %v1128_v7  ;;  %v800_v16 = vmax.f32 %v738_v9, 0.0 }
 0x347   :  { %v740_v12 = vpop.f32.mrf.mxu1 }
 0x348   :  { %v741_v13 = vadd.f32 %v1128_v7, %v740_v12  ;;  %v803_v14 = vmax.f32 %v749_v10, 0.0 }
 0x349   :  { %v1373_v15 = vpop.f32.mrf.mxu1 }
 0x34a   :  { %v801_v17 = vmax.f32 %v741_v13, 0.0  ;;  %v817_v21 = vpack.c.bf16 %v803_v14, %v802_v18  ;;  %v762_v25 = vadd.f32 %v1373_v15, %v1128_v7 }
 0x34b   :  { %v753_v19 = vpop.f32.mrf.mxu1 }
 0x34c   :  { %v816_v20 = vpack.c.bf16 %v801_v17, %v800_v16  ;;  %v754_v23 = vadd.f32 %v1128_v7, %v753_v19  ;;  %v806_v32 = vmax.f32 %v762_v25, 0.0 }
 0x34d   :  { %v1374_v22 = vpop.f32.mrf.mxu1 }
 0x34e   :  { %v765_v24 = vadd.f32 %v1374_v22, %v1128_v7  ;;  %1391 = vmatprep.mubr.msk.bf16.mxu0 %vm306_vm1, %v816_v20  ;;  %v804_v30 = vmax.f32 %v754_v23, 0.0 }
 0x34f   :  { %v756_v26 = vpop.f32.mrf.mxu1  ;;  %1392 = vmatmul.mubr.msk.bf16.vlgmr.msra.gmra.mxu0 %vm306_vm1, %v817_v21 }
 0x350   :  { %v757_v27 = vadd.f32 %v1128_v7, %v756_v26  ;;  %v807_v28 = vmax.f32 %v765_v24, 0.0 }
 0x351   :  { %v1377_v29 = vpop.f32.mrf.mxu1 }
 0x352   :  { %v805_v31 = vmax.f32 %v757_v27, 0.0  ;;  %v819_v35 = vpack.c.bf16 %v807_v28, %v806_v32  ;;  %v778_v39 = vadd.f32 %v1377_v29, %v1128_v7 }
 0x353   :  { %v769_v33 = vpop.f32.mrf.mxu1 }
 0x354   :  { %v818_v34 = vpack.c.bf16 %v805_v31, %v804_v30  ;;  %v770_v37 = vadd.f32 %v1128_v7, %v769_v33  ;;  %v810_v46 = vmax.f32 %v778_v39, 0.0 }
 0x355   :  { %v1378_v36 = vpop.f32.mrf.mxu1 }
 0x356   :  { %v781_v38 = vadd.f32 %v1378_v36, %v1128_v7  ;;  %1395 = vmatprep.mubr.msk.bf16.mxu0 %vm306_vm1, %v818_v34  ;;  %v808_v44 = vmax.f32 %v770_v37, 0.0 }
 0x357   :  { %v772_v40 = vpop.f32.mrf.mxu1  ;;  %1396 = vmatmul.mubr.msk.bf16.gmra.mxu0 %vm306_vm1, %v819_v35 }
 0x358   :  { %v773_v41 = vadd.f32 %v1128_v7, %v772_v40  ;;  %v811_v42 = vmax.f32 %v781_v38, 0.0 }
 0x359   :  { %v1381_v43 = vpop.f32.mrf.mxu1 }
 0x35a   :  { %v809_v45 = vmax.f32 %v773_v41, 0.0  ;;  %v821_v49 = vpack.c.bf16 %v811_v42, %v810_v46  ;;  %v794_v53 = vadd.f32 %v1381_v43, %v1128_v7 }
 0x35b   :  { %v785_v47 = vpop.f32.mrf.mxu1 }
 0x35c   :  { %v820_v48 = vpack.c.bf16 %v809_v45, %v808_v44  ;;  %v786_v51 = vadd.f32 %v1128_v7, %v785_v47  ;;  %v814_v59 = vmax.f32 %v794_v53, 0.0 }
 0x35d   :  { %v1382_v50 = vpop.f32.mrf.mxu1 }
 0x35e   :  { %v797_v52 = vadd.f32 %v1382_v50, %v1128_v7  ;;  %1399 = vmatprep.mubr.msk.bf16.mxu0 %vm306_vm1, %v820_v48  ;;  %v812_v57 = vmax.f32 %v786_v51, 0.0 }
 0x35f   :  { %v788_v54 = vpop.f32.mrf.mxu1  ;;  %1400 = vmatmul.mubr.msk.bf16.gmra.mxu0 %vm306_vm1, %v821_v49 }
 0x360   :  { %v789_v55 = vadd.f32 %v1128_v7, %v788_v54  ;;  %v815_v56 = vmax.f32 %v797_v52, 0.0 }
 0x362   :  { %v813_v58 = vmax.f32 %v789_v55, 0.0  ;;  %v823_v61 = vpack.c.bf16 %v815_v56, %v814_v59 }
 0x364   :  { %v822_v60 = vpack.c.bf16 %v813_v58, %v812_v57 }
 0x366   :  { %1403 = vmatprep.mubr.msk.bf16.mxu0 %vm306_vm1, %v822_v60 }
 0x367   :  { %1404 = vmatmul.mubr.msk.bf16.gmra.mxu0 %vm306_vm1, %v823_v61 }
 0x40f   :  { %v1393_v62 = vpop.f32.mrf.mxu0 }
 0x410   :  { %v930_v2 = vadd.f32 %v1393_v62, %v1141_v63 }
 0x411   :  { %v921_v0 = vpop.f32.mrf.mxu0 }
 0x412   :  { %v922_v5 = vadd.f32 %v1141_v63, %v921_v0 }
 0x413   :  { %v1394_v1 = vpop.f32.mrf.mxu0 }
 0x414   :  { %v933_v3 = vadd.f32 %v1394_v1, %v1141_v63 }
 0x415   :  { %v924_v4 = vpop.f32.mrf.mxu0 }
 0x416   :  { %v1194_v6 = vpack.c.bf16 %v933_v3, %v930_v2  ;;  %v925_v7 = vadd.f32 %v1141_v63, %v924_v4 }
 0x417   :  { %v1397_v8 = vpop.f32.mrf.mxu0 }
 0x418   :  { %1226 = vst [vmem:[#allocation5 + $0x8] sm:$0xff] %v1194_v6   ;;  %v1189_v9 = vpack.c.bf16 %v925_v7, %v922_v5  ;;  %v946_v12 = vadd.f32 %v1397_v8, %v1141_v63 }
 0x419   :  { %v937_v10 = vpop.f32.mrf.mxu0 }
 0x41a   :  { %1190 = vst [vmem:[#allocation5] sm:$0xff] %v1189_v9   ;;  %v938_v15 = vadd.f32 %v1141_v63, %v937_v10 }
 0x41b   :  { %v1398_v11 = vpop.f32.mrf.mxu0 }
 0x41c   :  { %v949_v13 = vadd.f32 %v1398_v11, %v1141_v63 }
 0x41d   :  { %v940_v14 = vpop.f32.mrf.mxu0 }
 0x41e   :  { %v1204_v16 = vpack.c.bf16 %v949_v13, %v946_v12  ;;  %v941_v17 = vadd.f32 %v1141_v63, %v940_v14 }
 0x41f   :  { %v1401_v18 = vpop.f32.mrf.mxu0 }
 0x420   :  { %1228 = vst [vmem:[#allocation5 + $0x18] sm:$0xff] %v1204_v16   ;;  %v1199_v19 = vpack.c.bf16 %v941_v17, %v938_v15  ;;  %v962_v22 = vadd.f32 %v1401_v18, %v1141_v63 }
 0x421   :  { %v953_v20 = vpop.f32.mrf.mxu0 }
 0x422   :  { %1227 = vst [vmem:[#allocation5 + $0x10] sm:$0xff] %v1199_v19   ;;  %v954_v25 = vadd.f32 %v1141_v63, %v953_v20 }
 0x423   :  { %v1402_v21 = vpop.f32.mrf.mxu0 }
 0x424   :  { %v965_v23 = vadd.f32 %v1402_v21, %v1141_v63 }
 0x425   :  { %v956_v24 = vpop.f32.mrf.mxu0 }
 0x426   :  { %v1214_v26 = vpack.c.bf16 %v965_v23, %v962_v22  ;;  %v957_v27 = vadd.f32 %v1141_v63, %v956_v24 }
 0x427   :  { %v1405_v28 = vpop.f32.mrf.mxu0 }
 0x428   :  { %1230 = vst [vmem:[#allocation5 + $0x28] sm:$0xff] %v1214_v26   ;;  %v1209_v29 = vpack.c.bf16 %v957_v27, %v954_v25  ;;  %v978_v32 = vadd.f32 %v1405_v28, %v1141_v63 }
 0x429   :  { %v969_v30 = vpop.f32.mrf.mxu0 }
 0x42a   :  { %1229 = vst [vmem:[#allocation5 + $0x20] sm:$0xff] %v1209_v29   ;;  %v970_v35 = vadd.f32 %v1141_v63, %v969_v30 }
 0x42b   :  { %v1406_v31 = vpop.f32.mrf.mxu0 }
 0x42c   :  { %v981_v33 = vadd.f32 %v1406_v31, %v1141_v63 }
 0x42d   :  { %v972_v34 = vpop.f32.mrf.mxu0 }
 0x42e   :  { %v1224_v36 = vpack.c.bf16 %v981_v33, %v978_v32  ;;  %v973_v37 = vadd.f32 %v1141_v63, %v972_v34 }
 0x430   :  { %1232 = vst [vmem:[#allocation5 + $0x38] sm:$0xff] %v1224_v36   ;;  %v1219_v38 = vpack.c.bf16 %v973_v37, %v970_v35 }
 0x432   :  { %1231 = vst [vmem:[#allocation5 + $0x30] sm:$0xff] %v1219_v38  }
 0x433   :  { %1472 = shalt.err (!%p1469_p9)
}
 0x434   :  { %1075 = dma.vmem_to_hbm [thread:$0]  %s1070_s17, 1024, %s1645_s7, [#allocation4], %s1486_s27, %s1486_s27, %s1487_s28  }
 0x435   :  { %1483 = dma.done.wait [#allocation4], 1024  }
 0x436   :  { %1484 = vsyncadd [#allocation4], 4294966272 }
 0x437   :  { %1079 = vsyncpa [#allocation3], 1 }
 0x438   :  { %1080 = vsyncpa [#allocation4], 1 }

</bundles_post_ra>
